<compile_context>
chip_gen: v7x
topology: tpu7x:2x2x1
jax: 0.10.0
libtpu: 0.0.40
codegen_flags: <defaults>
</compile_context>

<pallas_src>
import jax
import jax.numpy as jnp
from jax.experimental import pallas as pl
from jax.experimental.pallas import tpu as pltpu


def _copy_kernel(x_ref, o_ref):
    # clone(): straight elementwise copy of the current tile.
    o_ref[...] = x_ref[...]


# Per-block byte budget for the tiled path (2 x input + 2 x output buffers
# stay under ~8 MiB, well inside every generation's default scoped VMEM).
_BLOCK_BYTES = 2 * 1024 * 1024
# Arrays up to this size are copied as a single whole-array block.
_SINGLE_BLOCK_BYTES = 4 * 1024 * 1024


def _round_up(x: int, m: int) -> int:
    return ((x + m - 1) // m) * m


def _sublane_multiple(dtype) -> int:
    # Packed-sublane tiling: (8,128) for 32-bit, (16,128) for bf16/fp16,
    # (32,128) for int8/fp8.
    return max(8, 32 // jnp.dtype(dtype).itemsize)


def dump_x_clone(x: jax.Array) -> jax.Array:
    """Pallas equivalent of `tensor.clone()` (pure HBM->HBM copy)."""
    orig_shape = x.shape
    # Present a 2-D (rows, lanes) view, keeping the last dim lane-dense.
    if x.ndim == 0:
        x2 = x.reshape(1, 1)
    elif x.ndim == 1:
        x2 = x.reshape(1, x.shape[0])
    else:
        x2 = x.reshape(-1, x.shape[-1])
    n, f = x2.shape
    itemsize = jnp.dtype(x2.dtype).itemsize
    total_bytes = n * f * itemsize

    if total_bytes <= _SINGLE_BLOCK_BYTES:
        # Single grid point, whole array as one VMEM block: no pipeline
        # bookkeeping and no (8,128) divisibility constraint.
        out = pl.pallas_call(
            _copy_kernel,
            out_shape=jax.ShapeDtypeStruct((n, f), x2.dtype),
        )(x2)
        return out.reshape(orig_shape)

    # Large input: 1-D grid over rows, lane-dense block spanning the full
    # feature dim.
    sub = _sublane_multiple(x2.dtype)
    row_bytes = f * itemsize
    tile_rows = max(sub, (_BLOCK_BYTES // max(row_bytes, 1)) // sub * sub)
    tile_rows = min(tile_rows, _round_up(n, sub))
    grid = (pl.cdiv(n, tile_rows),)

    compiler_kwargs = dict(dimension_semantics=("parallel",))
    # Only kicks in for the rare very-wide-feature corner case where even the
    # minimal (sub-row) tile exceeds the 2 MiB budget.
    vmem_needed = 4 * tile_rows * row_bytes + (1 << 20)
    if vmem_needed > 16 * 1024 * 1024:
        compiler_kwargs["vmem_limit_bytes"] = min(vmem_needed, 48 * 1024 * 1024)

    out = pl.pallas_call(
        _copy_kernel,
        out_shape=jax.ShapeDtypeStruct((n, f), x2.dtype),
        grid=grid,
        in_specs=[pl.BlockSpec((tile_rows, f), lambda i: (i, 0))],
        out_specs=pl.BlockSpec((tile_rows, f), lambda i: (i, 0)),
        compiler_params=pltpu.CompilerParams(**compiler_kwargs),
    )(x2)
    return out.reshape(orig_shape)


class DumpX:
    """JAX/Pallas port of the PyTorch DumpX module (no parameters)."""

    def __init__(self, data_key_x: str, data_key_out: str):
        self.data_key_x = data_key_x
        self.data_key_out = data_key_out

    def __call__(self, data: dict) -> dict:
        data[self.data_key_out] = dump_x_clone(data[self.data_key_x])
        return data


if __name__ == "__main__":
    key = jax.random.PRNGKey(0)
    module = DumpX(data_key_x="x", data_key_out="per_atom_feats")

    # 1) Small per-atom feature tensor (single-block fast path).
    x_small = jax.random.normal(key, (16, 128), dtype=jnp.float32)
    data = module({"x": x_small})
    out = jax.block_until_ready(data["per_atom_feats"])
    assert out.shape == x_small.shape and out.dtype == x_small.dtype
    assert bool(jnp.all(out == x_small))

    # 2) Ragged atom count + bf16 features (shape not (8,128)-friendly).
    x_bf16 = jax.random.normal(key, (37, 192), dtype=jnp.bfloat16)
    data = module({"x": x_bf16})
    out = jax.block_until_ready(data["per_atom_feats"])
    assert out.shape == x_bf16.shape and out.dtype == x_bf16.dtype
    assert bool(jnp.all(out == x_bf16))

    # 3) Larger, non-multiple-of-8 atom count: exercises the tiled
    #    (1-D parallel row grid, lane-dense block) path with a partial
    #    last block.
    x_big = jax.random.normal(key, (4100, 256), dtype=jnp.float32)
    data = module({"x": x_big})
    out = jax.block_until_ready(data["per_atom_feats"])
    assert out.shape == x_big.shape and out.dtype == x_big.dtype
    assert bool(jnp.all(out == x_big))

    print("KERNEL_OK")
</pallas_src>

<mosaic_0001>
module attributes {stable_mosaic.version = 11 : i64} {
  func.func @_copy_kernel(%arg0: memref<16x128xf32, #tpu.memory_space<vmem>>, %arg1: memref<16x128xf32, #tpu.memory_space<vmem>>) attributes {dimension_semantics = [], scalar_prefetch = 0 : i64, scratch_operands = 0 : i64, tpu.core_type = #tpu.core_type<tc>} {
    %c0 = arith.constant 0 : index
    %c0_0 = arith.constant 0 : index
    %0 = vector.load %arg0[%c0, %c0_0] : memref<16x128xf32, #tpu.memory_space<vmem>>, vector<16x128xf32>
    %c0_1 = arith.constant 0 : index
    %c0_2 = arith.constant 0 : index
    %1 = vector.load %arg1[%c0_1, %c0_2] : memref<16x128xf32, #tpu.memory_space<vmem>>, vector<16x128xf32>
    tpu.vector_store %arg1[%c0_1, %c0_2], %0 {strides = array<i32>} : memref<16x128xf32, #tpu.memory_space<vmem>>, vector<16x128xf32>,
    return
  }
}

</mosaic_0001>

<bundles_post_ra>
// kernel: tpu_custom_call.1
= control target key start
LH: loop header
LB: loop body
LE: loop exit
PB: predicated region body
PF: predicated region fallthrough
CT: control target
= control target key end

     0   :  { %6 = vsyncpa [#allocation3], 0  ;;  %s134_s0 = inlined_call_operand.hbm [shape: f32[16,128], index: 0, kind: input, shape index: {}]   ;;  %s135_s1 = inlined_call_operand.hbm [shape: f32[16,128], index: 1, kind: output, shape index: {}]  }
   0x1   :  { %7 = vsyncpa [#allocation4], 0  ;;  %s96_s6 = smov [#allocation2]   ;;  %s48_s10 = scalar_lea.hbm %s134_s0, 256 }
   0x2   :  { %s13_s7 = sshll.u32 %s96_s6, 4  ;;  %p49_p0 = scmp.ne.s32.totalorder %s134_s0, %s48_s10  ;;  %s14_s7 = int_to_ptr.vmem [resolvable:$true] %s13_s7 }
   0x3   :  { %p52_p1 = scmp.lt.u32.totalorder %s48_s10, %s134_s0 }
   0x5   :  { %p54_p2 = pnand %p52_p1, %p49_p0 }
   0x7   :  { %57 = shalt.err (!%p54_p2)
}
   0x8   :  { %s58_s15 = scalar_lea.vmem %s14_s7, 256  ;;  %p63_p4 = scmp.lt.s32.totalorder %s14_s7, %s14_s7 }
   0x9   :  { %p59_p3 = scmp.ne.s32.totalorder %s14_s7, %s58_s15  ;;  %p64_p5 = scmp.lt.s32.totalorder %s58_s15, %s58_s15 }
   0xb   :  { %p65_p6 = por %p64_p5, %p63_p4 }
   0xd   :  { %p66_p7 = pnand %p65_p6, %p59_p3 }
   0xf   :  { %69 = shalt.err (!%p66_p7)
}
  0x10   :  { %s97_s16 = smov 128   ;;  %s98_s17 = smov 8  }
  0x11   :  { %19 = dma.hbm_to_vmem [thread:$0]  %s134_s0, 256, %s14_s7, [#allocation3], %s97_s16, %s97_s16, %s98_s17  }
  0x12   :  { %92 = dma.done.wait [#allocation3], 256  }
  0x13   :  { %93 = vsyncadd [#allocation3], 4294967040  ;;  %s99_s20 = smov [#allocation5]   ;;  %v23_v0 = vld [vmem:[#allocation2] sm:$0xff]  ;;  %v24_v1 = vld [vmem:[#allocation2 + $0x8] sm:$0xff] }
  0x14   :  { %s32_s21 = sshll.u32 %s99_s20, 4  ;;  %25 = vst [vmem:[#allocation5] sm:$0xff] %v23_v0  ;;  %26 = vst [vmem:[#allocation5 + $0x8] sm:$0xff] %v24_v1  ;;  %s33_s21 = int_to_ptr.vmem [resolvable:$true] %s32_s21 }
  0x15   :  { %s70_s22 = scalar_lea.vmem %s33_s21, 256  ;;  %p75_p9 = scmp.lt.s32.totalorder %s33_s21, %s33_s21 }
  0x16   :  { %p71_p8 = scmp.ne.s32.totalorder %s33_s21, %s70_s22  ;;  %p76_p10 = scmp.lt.s32.totalorder %s70_s22, %s70_s22 }
  0x18   :  { %p77_p11 = por %p76_p10, %p75_p9 }
  0x1a   :  { %p78_p12 = pnand %p77_p11, %p71_p8 }
  0x1c   :  { %81 = shalt.err (!%p78_p12)
}
  0x1d   :  { %s82_s0 = scalar_lea.hbm %s135_s1, 256 }
  0x1e   :  { %p83_p13 = scmp.ne.s32.totalorder %s135_s1, %s82_s0  ;;  %p86_p0 = scmp.lt.u32.totalorder %s82_s0, %s135_s1 }
  0x20   :  { %p88_p1 = pnand %p86_p0, %p83_p13 }
  0x22   :  { %91 = shalt.err (!%p88_p1)
}
  0x23   :  { %38 = dma.vmem_to_hbm [thread:$0]  %s33_s21, 256, %s135_s1, [#allocation4], %s97_s16, %s97_s16, %s98_s17  }
  0x24   :  { %94 = dma.done.wait [#allocation4], 256  }
  0x25   :  { %95 = vsyncadd [#allocation4], 4294967040 }
  0x26   :  { %42 = vsyncpa [#allocation3], 1 }
  0x27   :  { %43 = vsyncpa [#allocation4], 1 }

</bundles_post_ra>
